<compile_context>
chip_gen: v6e
topology: v6e:2x2x1
jax: 0.10.0
libtpu: 0.0.40
codegen_flags: <defaults>
</compile_context>

<pallas_src>
import functools

import jax
import jax.numpy as jnp
from jax.experimental import pallas as pl
from jax.experimental.pallas import tpu as pltpu


def _round_up(x: int, m: int) -> int:
    return ((x + m - 1) // m) * m


def _default_batch_tile() -> int:
    # 256-row LHS fills the 2x256x256 MXUs on v6e/v7x; 128 matches the 128x128
    # MXUs on v4/v5e/v5p.
    try:
        kind = jax.devices()[0].device_kind.lower()
    except Exception:
        return 128
    return 256 if ("v6" in kind or "v7" in kind) else 128


def _embed_gather_kernel(lbl_ref, table_ref, out_ref):
    # lbl_ref:   (TB, 1)  int32 effective labels (CFG drop already folded in).
    # table_ref: (V, Hp)  embedding table, VMEM-resident across the whole grid.
    # out_ref:   (TB, Hp) output tile (Hp is a multiple of 128 -> lane-dense stores).
    lbl = lbl_ref[...]
    tb = lbl.shape[0]
    v = table_ref.shape[0]
    # One-hot gather on the MXU: (TB, V) @ (V, Hp) -> (TB, Hp) in one systolic pass.
    onehot = (jax.lax.broadcasted_iota(jnp.int32, (tb, v), 1) == lbl).astype(
        table_ref.dtype
    )
    # precision=HIGHEST: the bf16-native MXUs of v6e/v7x would otherwise truncate the
    # f32 table in a single pass; with HIGHEST the one-hot gather reproduces the f32
    # rows exactly.  (With a bf16 table the gather is exact by construction.)
    acc = jnp.dot(
        onehot,
        table_ref[...],
        preferred_element_type=jnp.float32,
        precision=jax.lax.Precision.HIGHEST,
    )
    out_ref[...] = acc.astype(out_ref.dtype)


def pallas_embedding_gather(labels: jax.Array, table: jax.Array) -> jax.Array:
    """Returns table[labels] (labels already include any CFG drop) via one fused call."""
    labels = labels.astype(jnp.int32)
    (b,) = labels.shape
    v, h = table.shape
    itemsize = table.dtype.itemsize

    # Lane-dense output insurance: pad H to a multiple of 128 (sliced back at the end).
    h_pad = _round_up(h, 128)
    if h_pad != h:
        table = jnp.pad(table, ((0, 0), (0, h_pad - h)))

    # Prefer a single grid step covering the whole (sublane-padded) batch whenever the
    # VMEM footprint is comfortable; otherwise tile the batch.
    b8 = _round_up(b, 8)
    single_step_bytes = (
        v * h_pad * itemsize            # table (single-buffered)
        + 2 * b8 * h_pad * itemsize     # output tile (double-buffered)
        + 4 * b8 * (v + h_pad)          # in-kernel one-hot + f32 accumulator
    )
    if single_step_bytes <= 20 * 1024 * 1024:
        tb = b8
    else:
        tb = _default_batch_tile()
    b_pad = _round_up(b, tb)
    if b_pad != b:
        # Pad with class 0 (a valid row); padded rows are sliced off below.
        labels = jnp.pad(labels, (0, b_pad - b))
    labels2 = labels.reshape(b_pad, 1)

    # Table: constant index_map -> DMA'd once; single-buffer it so it does not reserve
    # 2x its size in VMEM.
    try:
        table_spec = pl.BlockSpec(
            (v, h_pad), lambda i: (0, 0), pipeline_mode=pl.Buffered(1)
        )
    except (TypeError, AttributeError):  # fallback for jax versions without pipeline_mode
        table_spec = pl.BlockSpec((v, h_pad), lambda i: (0, 0))

    # TODO(synk): for very large vocabularies (V*H*itemsize approaching the scoped VMEM
    # limit, e.g. on v7x) add an inner "arbitrary" reduction axis over V (tile the table
    # as (tk, Hp), accumulate into a VMEM scratch with pl.when init/finalize) or switch
    # to a manual DMA row-gather; DiT-scale V (<= ~1K) never needs it.

    out = pl.pallas_call(
        _embed_gather_kernel,
        out_shape=jax.ShapeDtypeStruct((b_pad, h_pad), table.dtype),
        grid=(b_pad // tb,),
        in_specs=[
            pl.BlockSpec((tb, 1), lambda i: (i, 0)),   # effective-label tile
            table_spec,                                # whole table, VMEM-resident
        ],
        out_specs=pl.BlockSpec((tb, h_pad), lambda i: (i, 0)),
        compiler_params=pltpu.CompilerParams(
            dimension_semantics=("parallel",),
        ),
    )(labels2, table)

    return out[:b, :h]


def label_embedder_forward(
    labels: jax.Array,
    embedding_table: jax.Array,
    *,
    num_classes: int,
    dropout_prob: float,
    train: bool,
    force_drop_ids: jax.Array | None = None,
    drop_key: jax.Array | None = None,
) -> jax.Array:
    """Mirrors RefLabelEmbedder.forward (token_drop + embedding lookup)."""
    use_dropout = dropout_prob > 0
    b = labels.shape[0]
    labels = labels.astype(jnp.int32)
    apply_drop = (train and use_dropout) or (force_drop_ids is not None)

    if apply_drop:
        # token_drop targets row `num_classes`, which only exists when dropout_prob > 0
        # (use_cfg_embedding).  Fail loudly instead of gathering a nonexistent row.
        if embedding_table.shape[0] <= num_classes:
            raise ValueError(
                "token_drop requested but embedding table has no CFG null row "
                f"(table rows={embedding_table.shape[0]}, num_classes={num_classes})."
            )
        if force_drop_ids is None:
            # torch.rand(labels.shape[0]) < dropout_prob  (RNG drawn in the JAX glue).
            drop_ids = jax.random.uniform(drop_key, (b,)) < dropout_prob
        else:
            drop_ids = force_drop_ids == 1
        # Fold the CFG drop into the labels here (fuses with the pad/reshape XLA ops):
        # one fewer kernel input stream / per-step DMA.
        labels = jnp.where(drop_ids, jnp.int32(num_classes), labels)

    return pallas_embedding_gather(labels, embedding_table)


if __name__ == "__main__":
    num_classes = 16
    hidden_size = 128
    dropout_prob = 0.1
    batch = 8

    key = jax.random.PRNGKey(0)
    k_table, k_labels, k_drop, k_force, k_table_b, k_labels_b = jax.random.split(key, 6)

    # nn.Embedding default init: N(0, 1).  Extra row for the CFG "null" class.
    vocab = num_classes + int(dropout_prob > 0)
    embedding_table = jax.random.normal(
        k_table, (vocab, hidden_size), dtype=jnp.float32
    )
    labels = jax.random.randint(k_labels, (batch,), 0, num_classes, dtype=jnp.int32)
    force_drop_ids = jax.random.randint(k_force, (batch,), 0, 2, dtype=jnp.int32)

    fwd = functools.partial(
        label_embedder_forward,
        num_classes=num_classes,
        dropout_prob=dropout_prob,
    )

    # Case 1: eval, no forced drops -> plain gather.
    out_eval = jax.block_until_ready(fwd(labels, embedding_table, train=False))

    # Case 2: forced drop ids (deterministic CFG dropout path).
    out_forced = jax.block_until_ready(
        fwd(labels, embedding_table, train=False, force_drop_ids=force_drop_ids)
    )

    # Case 3: train-mode stochastic dropout (randomness drawn in JAX glue).
    out_train = jax.block_until_ready(
        fwd(labels, embedding_table, train=True, drop_key=k_drop)
    )

    # Reference checks in plain JAX.
    ref_eval = jnp.take(embedding_table, labels, axis=0)
    ref_forced = jnp.take(
        embedding_table, jnp.where(force_drop_ids == 1, num_classes, labels), axis=0
    )

    assert out_eval.shape == (batch, hidden_size)
    assert jnp.allclose(out_eval, ref_eval, atol=1e-5)
    assert jnp.allclose(out_forced, ref_forced, atol=1e-5)

    # Train-mode: each row must equal either its label's row or the CFG null row.
    null_row = embedding_table[num_classes][None, :]
    row_is_label = jnp.all(jnp.isclose(out_train, ref_eval, atol=1e-5), axis=-1)
    row_is_null = jnp.all(jnp.isclose(out_train, null_row, atol=1e-5), axis=-1)
    assert out_train.shape == (batch, hidden_size)
    assert bool(jnp.all(row_is_label | row_is_null))

    # Unaligned shapes exercise the batch-pad and lane-pad (H -> 128) paths.
    table_b = jax.random.normal(k_table_b, (11, 96), dtype=jnp.float32)  # 10 classes + CFG row
    labels_b = jax.random.randint(k_labels_b, (5,), 0, 10, dtype=jnp.int32)
    out_b = jax.block_until_ready(
        label_embedder_forward(
            labels_b, table_b, num_classes=10, dropout_prob=0.1, train=False
        )
    )
    assert out_b.shape == (5, 96)
    assert jnp.allclose(out_b, jnp.take(table_b, labels_b, axis=0), atol=1e-5)

    print("KERNEL_OK")
</pallas_src>

<mosaic_0001>
module attributes {stable_mosaic.version = 11 : i64} {
  func.func @_embed_gather_kernel(%arg0: i32, %arg1: memref<8x1xi32, #tpu.memory_space<vmem>>, %arg2: memref<17x128xf32, #tpu.memory_space<vmem>>, %arg3: memref<8x128xf32, #tpu.memory_space<vmem>>) attributes {dimension_semantics = [#tpu.dimension_semantics<parallel>], iteration_bounds = array<i64: 1>, scalar_prefetch = 0 : i64, scratch_operands = 0 : i64, tpu.core_type = #tpu.core_type<tc>, window_params = [{transform_indices = @transform_0, window_bounds = array<i64: 8, 1>}, {pipeline_mode = #tpu.pipeline_mode<synchronous>, transform_indices = @transform_1, window_bounds = array<i64: 17, 128>}, {transform_indices = @transform_2, window_bounds = array<i64: 8, 128>}]} {
    %c0 = arith.constant 0 : index
    %c0_0 = arith.constant 0 : index
    %0 = vector.load %arg1[%c0, %c0_0] : memref<8x1xi32, #tpu.memory_space<vmem>>, vector<8x1xi32>
    %1 = tpu.iota {dimensions = array<i32: 1>} : vector<8x17xi32>
    %2 = vector.broadcast %0 : vector<8x1xi32> to vector<8x17xi32>
    %3 = arith.cmpi eq, %1, %2 : vector<8x17xi32>
    %4 = arith.extui %3 : vector<8x17xi1> to vector<8x17xi32>
    %5 = arith.sitofp %4 : vector<8x17xi32> to vector<8x17xf32>
    %c0_1 = arith.constant 0 : index
    %c0_2 = arith.constant 0 : index
    %6 = vector.load %arg2[%c0_1, %c0_2] : memref<17x128xf32, #tpu.memory_space<vmem>>, vector<17x128xf32>
    %cst = arith.constant dense<0.000000e+00> : vector<8x128xf32>
    %7 = tpu.matmul %5, %6, %cst {dimension_numbers = #tpu.dot_dimension_numbers<[1], [0], [0], [1], [0, 0, 1, 1], [], []>, precision = #tpu.contract_precision<fp32>} : vector<8x17xf32>, vector<17x128xf32>, vector<8x128xf32> -> vector<8x128xf32>
    %c0_3 = arith.constant 0 : index
    %c0_4 = arith.constant 0 : index
    %8 = vector.load %arg3[%c0_3, %c0_4] : memref<8x128xf32, #tpu.memory_space<vmem>>, vector<8x128xf32>
    tpu.vector_store %arg3[%c0_3, %c0_4], %7 {strides = array<i32>} : memref<8x128xf32, #tpu.memory_space<vmem>>, vector<8x128xf32>,
    return
  }
  func.func @transform_0(%arg0: i32) -> (i32, i32) {
    %c0_i32 = arith.constant 0 : i32
    %c0_i32_0 = arith.constant 0 : i32
    return %arg0, %c0_i32 : i32, i32
  }
  func.func @transform_1(%arg0: i32) -> (i32, i32) {
    %c0_i32 = arith.constant 0 : i32
    %c0_i32_0 = arith.constant 0 : i32
    %c0_i32_1 = arith.constant 0 : i32
    return %c0_i32, %c0_i32_0 : i32, i32
  }
  func.func @transform_2(%arg0: i32) -> (i32, i32) {
    %c0_i32 = arith.constant 0 : i32
    %c0_i32_0 = arith.constant 0 : i32
    return %arg0, %c0_i32 : i32, i32
  }
}

</mosaic_0001>

<bundles_post_ra>
// kernel: tpu_custom_call.1
= control target key start
LH: loop header
LB: loop body
LE: loop exit
PB: predicated region body
PF: predicated region fallthrough
CT: control target
= control target key end

     0   :  { %7 = vsyncpa [#allocation3], 0  ;;  %s744_s0 = inlined_call_operand.vmem [shape: s32[8,1], index: 0, kind: input, shape index: {}]   ;;  %s745_s1 = inlined_call_operand.hbm [shape: f32[17,128], index: 1, kind: input, shape index: {}]   ;;  %s746_s2 = inlined_call_operand.hbm [shape: f32[8,128], index: 2, kind: output, shape index: {}]  }
   0x1   :  { %8 = vsyncpa [#allocation4], 0  ;;  %s668_s9 = smov [#allocation2]  }
   0x2   :  { %s16_s10 = sshll.u32 %s668_s9, 4  ;;  %s17_s10 = int_to_ptr.vmem [resolvable:$true] %s16_s10 }
   0x3   :  { %s632_s11 = scalar_lea.vmem %s17_s10, 384  ;;  %p637_p1 = scmp.lt.s32.totalorder %s17_s10, %s17_s10 }
   0x4   :  { %p633_p0 = scmp.ne.s32.totalorder %s17_s10, %s632_s11  ;;  %p638_p2 = scmp.lt.s32.totalorder %s632_s11, %s632_s11 }
   0x6   :  { %p639_p3 = por %p638_p2, %p637_p1 }
   0x8   :  { %p640_p4 = pnand %p639_p3, %p633_p0 }
   0xa   :  { %643 = shalt.err (!%p640_p4)
}
   0xb   :  { %s669_s12 = smov 128   ;;  %s670_s13 = smov 8  }
   0xc   :  { %22 = dma.hbm_to_vmem [thread:$0]  %s745_s1, 384, %s17_s10, [#allocation3], %s669_s12, %s669_s12, %s670_s13  }
   0xd   :  { %664 = dma.done.wait [#allocation3], 384  }
   0xe   :  { %665 = vsyncadd [#allocation3], 4294966912  ;;  %v671_v0 = vmov 0   ;;  %v672_v1 = vmov 0.0   ;;  %vm42_vm0 = vcmask 1040384   ;;  %vm673_vm1 = vmmov 0  }
   0xf   :  { %623 = vset.pattern.permute.xlu0 %v671_v0  ;;  %571 = vmatprep.subr.mxu1 %v672_v1  ;;  %v26_v2 = vld [vmem:[%s744_s0] sm:$0xff]  ;;  %v37_v3 = vld [vmem:[#allocation2 + $0x10] sm:$0x1]  ;;  %v36_v4 = vld [vmem:[#allocation2 + $0x8] sm:$0xff]  ;;  %v27_v22 = vlaneseq  ;;  %vm38_vm2 = vcmask 138240   ;;  %s674_s0 = smov [#allocation5]  }
  0x10   :  { %562 = vmatprep.subr.mxu0 %v672_v1  ;;  %577 = vmatprep.mubr.msk.f32.mxu1 %vm673_vm1, %v672_v1  ;;  %v44_v5 = vsel %vm42_vm0, %v37_v3, 0  ;;  %v76_v6 = vand.u32 4294901760, %v36_v4  ;;  %v35_v7 = vld [vmem:[#allocation2] sm:$0xff]  ;;  %s525_s1 = sshll.u32 %s674_s0, 4  ;;  %s526_s1 = int_to_ptr.vmem [resolvable:$true] %s525_s1 }
  0x11   :  { %568 = vmatprep.mubr.msk.f32.mxu0 %vm673_vm1, %v672_v1  ;;  %30 = vperm.xlu0 %623, %v26_v2   ;;  %v73_v8 = vand.u32 4294901760, %v44_v5  ;;  %v79_v9 = vand.u32 4294901760, %v35_v7  ;;  %v28_v23 = vand.u32 127, %v27_v22  ;;  %s644_s18 = scalar_lea.vmem %s526_s1, 128  ;;  %p649_p6 = scmp.lt.s32.totalorder %s526_s1, %s526_s1 }
  0x12   :  { %v702_v10 = vsub.f32 %v36_v4, %v76_v6  ;;  %p645_p5 = scmp.ne.s32.totalorder %s526_s1, %s644_s18  ;;  %p650_p7 = scmp.lt.s32.totalorder %s644_s18, %s644_s18 }
  0x13   :  { %v152_v11 = vsub.f32 %v44_v5, %v73_v8  ;;  %v704_v12 = vsub.f32 %v35_v7, %v79_v9  ;;  %563 = vmatpush3.msra.mxu0 %v73_v8 }
  0x14   :  { %v160_v13 = vand.u32 4294901760, %v702_v10  ;;  %564 = vmatprep.subr.mxu0 %v672_v1  ;;  %p651_p8 = por %p650_p7, %p649_p6 }
  0x15   :  { %v153_v14 = vand.u32 4294901760, %v152_v11  ;;  %v167_v15 = vand.u32 4294901760, %v704_v12  ;;  %565 = vmatpush3.msra.mxu0 %v76_v6 }
  0x16   :  { %v161_v16 = vsub.f32 %v702_v10, %v160_v13  ;;  %566 = vmatprep.subr.mxu0 %v672_v1  ;;  %p652_p9 = pnand %p651_p8, %p645_p5 }
  0x17   :  { %v154_v17 = vsub.f32 %v152_v11, %v153_v14  ;;  %v168_v18 = vsub.f32 %v704_v12, %v167_v15  ;;  %567 = vmatpush3.msra.mxu0 %v79_v9 }
  0x18   :  { %580 = vmatprep.subr.mxu0 %v672_v1  ;;  %v162_v20 = vand.u32 4294901760, %v161_v16 }
  0x19   :  { %v155_v19 = vand.u32 4294901760, %v154_v17  ;;  %v169_v21 = vand.u32 4294901760, %v168_v18 }
  0x1b   :  { %572 = vmatpush3.msra.mxu1 %v155_v19 }
  0x1c   :  { %573 = vmatprep.subr.mxu1 %v672_v1 }
  0x1d   :  { %574 = vmatpush3.msra.mxu1 %v162_v20 }
  0x1e   :  { %575 = vmatprep.subr.mxu1 %v672_v1 }
  0x1f   :  { %576 = vmatpush3.msra.mxu1 %v169_v21 }
  0x20   :  { %589 = vmatprep.subr.mxu1 %v672_v1 }
  0x8c   :  { %v31_v24 = vpop.permute.xlu0 %30 }
  0x8d   :  { %vm32_vm3 = vcmp.eq.s32.totalorder %v28_v23, %v31_v24 }
  0x8e   :  { %v534_v25 = vsel %vm32_vm3, 1.0, %v672_v1 }
  0x8f   :  { %v40_v26 = vsel %vm38_vm2, %v534_v25, 0  ;;  %578 = vmatmul.mubr.msk.f32.vlgmr.msra.gmra.mxu1 %vm38_vm2, %v534_v25 }
  0x90   :  { %v115_v27 = vsub.f32 %v40_v26, %v40_v26  ;;  %590 = vmatpush3.msra.mxu1 %v73_v8  ;;  %595 = vmatprep.mubr.msk.f32.mxu1 %vm673_vm1, %v672_v1 }
  0x91   :  { %591 = vmatprep.subr.mxu1 %v672_v1 }
  0x92   :  { %592 = vmatpush3.msra.mxu1 %v76_v6  ;;  %v116_v28 = vand.u32 4294901760, %v115_v27 }
  0x93   :  { %593 = vmatprep.subr.mxu1 %v672_v1 }
  0x94   :  { %594 = vmatpush3.msra.mxu1 %v79_v9  ;;  %v117_v29 = vsub.f32 %v115_v27, %v116_v28 }
  0x95   :  { %596 = vmatmul.mubr.f32.vlgmr.msra.gmra.mxu1 %v116_v28  ;;  %607 = vmatprep.subr.mxu1 %v672_v1 }
  0x96   :  { %608 = vmatpush3.msra.mxu1 %v73_v8  ;;  %v118_v30 = vand.u32 4294901760, %v117_v29  ;;  %613 = vmatprep.mubr.msk.f32.mxu1 %vm673_vm1, %v672_v1 }
  0x97   :  { %609 = vmatprep.subr.mxu1 %v672_v1 }
  0x98   :  { %610 = vmatpush3.msra.mxu1 %v76_v6  ;;  %569 = vmatmul.mubr.f32.vlgmr.msra.gmra.mxu0 %v118_v30 }
  0x99   :  { %581 = vmatpush3.msra.mxu0 %v152_v11  ;;  %611 = vmatprep.subr.mxu1 %v672_v1 }
  0x9a   :  { %582 = vmatprep.subr.mxu0 %v672_v1  ;;  %612 = vmatpush3.msra.mxu1 %v79_v9 }
  0x9b   :  { %583 = vmatpush3.msra.mxu0 %v702_v10  ;;  %614 = vmatmul.mubr.msk.f32.vlgmr.msra.gmra.mxu1 %vm38_vm2, %v534_v25 }
  0x9c   :  { %584 = vmatprep.subr.mxu0 %v672_v1  ;;  %586 = vmatprep.mubr.msk.f32.mxu0 %vm673_vm1, %v672_v1 }
  0x9d   :  { %585 = vmatpush3.msra.mxu0 %v704_v12 }
  0x9e   :  { %587 = vmatmul.mubr.f32.vlgmr.msra.gmra.mxu0 %v115_v27  ;;  %598 = vmatprep.subr.mxu0 %v672_v1 }
  0x9f   :  { %599 = vmatpush3.msra.mxu0 %v153_v14  ;;  %604 = vmatprep.mubr.msk.f32.mxu0 %vm673_vm1, %v672_v1 }
  0xa0   :  { %600 = vmatprep.subr.mxu0 %v672_v1 }
  0xa1   :  { %601 = vmatpush3.msra.mxu0 %v160_v13 }
  0xa2   :  { %602 = vmatprep.subr.mxu0 %v672_v1 }
  0xa3   :  { %603 = vmatpush3.msra.mxu0 %v167_v15 }
  0xa4   :  { %605 = vmatmul.mubr.msk.f32.vlgmr.msra.gmra.mxu0 %vm38_vm2, %v534_v25 }
 0x14f   :  { %v206_v31 = vpop.f32.mrf.mxu1 }
 0x151   :  { %v579_v32 = vpop.f32.mrf.mxu1 }
 0x155   :  { %v360_v33 = vpop.f32.mrf.mxu1 }
 0x157   :  { %v597_v34 = vpop.f32.mrf.mxu1 }
 0x158   :  { %v120_v35 = vpop.f32.mrf.mxu0 }
 0x159   :  { %v207_v38 = vadd.f32 %v206_v31, %v120_v35 }
 0x15a   :  { %v570_v36 = vpop.f32.mrf.mxu0 }
 0x15b   :  { %v514_v37 = vpop.f32.mrf.mxu1 }
 0x15d   :  { %v615_v39 = vpop.f32.mrf.mxu1 }
 0x15e   :  { %v284_v40 = vpop.f32.mrf.mxu0 }
 0x15f   :  { %v285_v41 = vadd.f32 %v284_v40, %v207_v38 }
 0x160   :  { %v588_v42 = vpop.f32.mrf.mxu0 }
 0x161   :  { %v361_v43 = vadd.f32 %v360_v33, %v285_v41 }
 0x164   :  { %v440_v44 = vpop.f32.mrf.mxu0 }
 0x165   :  { %v441_v45 = vadd.f32 %v440_v44, %v361_v43 }
 0x166   :  { %v606_v46 = vpop.f32.mrf.mxu0 }
 0x167   :  { %v515_v47 = vadd.f32 %v514_v37, %v441_v45 }
 0x169   :  { %518 = vst [vmem:[#allocation5] sm:$0xff] %v515_v47 }
 0x16a   :  { %655 = shalt.err (!%p652_p9)
}
 0x16b   :  { %528 = dma.vmem_to_hbm [thread:$0]  %s526_s1, 128, %s746_s2, [#allocation4]  }
 0x16c   :  { %666 = dma.done.wait [#allocation4], 128  }
 0x16d   :  { %667 = vsyncadd [#allocation4], 4294967168 }
 0x16e   :  { %532 = vsyncpa [#allocation3], 1 }
 0x16f   :  { %533 = vsyncpa [#allocation4], 1 }

</bundles_post_ra>
